<compile_context>
chip_gen: v7x
topology: tpu7x:2x2x1
jax: 0.10.0
libtpu: 0.0.40
codegen_flags: <defaults>
</compile_context>

<pallas_src>
import jax
import jax.numpy as jnp
from jax import lax
from jax.experimental import pallas as pl
from jax.experimental.pallas import tpu as pltpu


def _round_up(x: int, m: int) -> int:
    return ((x + m - 1) // m) * m


def net_forward(x, w0, w1, w2, b0, b1, b2, *, batch_tile=None, use_bf16=True):
    """Pallas implementation of Net.forward.

    x: [B, D] float32.  w_i: [D, D] in the PyTorch F.linear convention
    (out_features, in_features).  b_i: [D].  Any B is accepted; the last
    block may be ragged (Pallas masks the out-of-bounds rows).
    """
    B, D = x.shape
    out_dtype = x.dtype
    cdt = jnp.bfloat16 if use_bf16 else jnp.float32

    # ---- batch tile heuristic ----
    if batch_tile is None:
        if B <= 16:
            batch_tile = _round_up(max(B, 1), 8)            # tiny: single step
        else:
            # >= 2 grid steps (keeps both v7x TCs busy); <= 2048 rows per tile
            # to amortize per-step overhead without stressing VMEM.
            batch_tile = min(2048, _round_up(pl.cdiv(B, 2), 8))
    batch_tile = max(8, _round_up(int(batch_tile), 8))
    grid = (pl.cdiv(B, batch_tile),)

    # Stack biases into a single (3, D) operand (one DMA descriptor).
    b_stack = jnp.stack([b0, b1, b2], axis=0).astype(jnp.float32)

    def kernel(x_ref, w0_ref, w1_ref, w2_ref, b_ref, o_ref):
        # F.linear: a @ W.T + b, contracting on W's second axis (no transpose
        # materialized).  Accumulation is always f32; bias adds stay f32.
        def lin(a, w_ref, row):
            h = lax.dot_general(
                a, w_ref[...].astype(cdt),
                dimension_numbers=(((1,), (1,)), ((), ())),
                preferred_element_type=jnp.float32)
            return h + b_ref[row:row + 1, :]

        h = lin(x_ref[...].astype(cdt), w0_ref, 0)   # cast in-register, not in HBM
        h = lin(h.astype(cdt), w1_ref, 1)
        h = lin(h.astype(cdt), w2_ref, 2)
        o_ref[...] = h.astype(o_ref.dtype)

    # ---- VMEM budget (x/out double-buffered, weights/bias single-buffered) ----
    est = (2 * batch_tile * D * 4        # x tiles (f32 in HBM, cast in-kernel)
           + 2 * batch_tile * D * 4      # out tiles
           + 3 * D * D * 4               # weights, single-buffered
           + 3 * D * 4                   # biases
           + 4 * batch_tile * D * 4)     # f32/bf16 in-kernel temporaries (headroom)
    try:
        phys_vmem = int(pltpu.get_tpu_info().vmem_capacity_bytes)
    except Exception:
        phys_vmem = 64 * 1024 * 1024     # v7x per-TC floor
    cp_kwargs = dict(dimension_semantics=("parallel",))
    if est > 14 * 1024 * 1024:           # below v5e's 16 MiB scoped default
        cp_kwargs["vmem_limit_bytes"] = int(min(est + (8 << 20),
                                                phys_vmem - (8 << 20)))

    itemsize = jnp.dtype(out_dtype).itemsize
    cost = pl.CostEstimate(
        flops=6 * B * D * D,                                  # 3 matmuls
        transcendentals=0,
        bytes_accessed=2 * B * D * itemsize + 3 * D * D * 4 + 3 * D * 4,
    )

    # Grid-invariant operands: single-buffered.
    w_spec = pl.BlockSpec((D, D), lambda i: (0, 0), pipeline_mode=pl.Buffered(1))
    b_spec = pl.BlockSpec((3, D), lambda i: (0, 0), pipeline_mode=pl.Buffered(1))

    return pl.pallas_call(
        kernel,
        out_shape=jax.ShapeDtypeStruct((B, D), out_dtype),
        grid_spec=pltpu.PrefetchScalarGridSpec(
            num_scalar_prefetch=0,
            grid=grid,
            in_specs=[
                pl.BlockSpec((batch_tile, D), lambda i: (i, 0)),   # x tiles
                w_spec, w_spec, w_spec,                            # W0, W1, W2
                b_spec,                                            # stacked biases
            ],
            out_specs=pl.BlockSpec((batch_tile, D), lambda i: (i, 0)),
        ),
        compiler_params=pltpu.CompilerParams(**cp_kwargs),
        cost_estimate=cost,
    )(x, w0, w1, w2, b_stack)


def net_reference(x, w0, w1, w2, b0, b1, b2):
    h = x @ w0.T + b0
    h = h @ w1.T + b1
    return h @ w2.T + b2


if __name__ == "__main__":
    size = 128  # "size" from Net.__init__

    key = jax.random.PRNGKey(0)
    kx, k0, k1, k2, kb0, kb1, kb2 = jax.random.split(key, 7)

    weights_0 = jax.random.normal(k0, (size, size), dtype=jnp.float32)
    weights_1 = jax.random.normal(k1, (size, size), dtype=jnp.float32)
    weights_2 = jax.random.normal(k2, (size, size), dtype=jnp.float32)
    bias_0 = jax.random.normal(kb0, (size,), dtype=jnp.float32)
    bias_1 = jax.random.normal(kb1, (size,), dtype=jnp.float32)
    bias_2 = jax.random.normal(kb2, (size,), dtype=jnp.float32)

    # 1) small batch, exact f32 path (matches PyTorch float32 semantics).
    batch = 8
    x = jax.random.normal(kx, (batch, size), dtype=jnp.float32)
    out = jax.block_until_ready(
        net_forward(x, weights_0, weights_1, weights_2, bias_0, bias_1, bias_2,
                    use_bf16=False))
    ref = net_reference(x, weights_0, weights_1, weights_2, bias_0, bias_1, bias_2)
    assert out.shape == (batch, size)
    assert jnp.allclose(out, ref, rtol=1e-4, atol=1e-3), "f32 small-batch mismatch"

    # 2) non-multiple batch: multi-step grid + ragged (masked) last block, f32.
    batch2 = 300
    x2 = jax.random.normal(jax.random.PRNGKey(1), (batch2, size), dtype=jnp.float32)
    out2 = jax.block_until_ready(
        net_forward(x2, weights_0, weights_1, weights_2, bias_0, bias_1, bias_2,
                    use_bf16=False))
    ref2 = net_reference(x2, weights_0, weights_1, weights_2, bias_0, bias_1, bias_2)
    assert out2.shape == (batch2, size)
    assert jnp.allclose(out2, ref2, rtol=1e-4, atol=1e-3), "f32 ragged-batch mismatch"

    # 3) default fast path: bf16 operands with f32 accumulation (~1e-2 rel err).
    out3 = jax.block_until_ready(
        net_forward(x2, weights_0, weights_1, weights_2, bias_0, bias_1, bias_2))
    rel_err = float(jnp.max(jnp.abs(out3 - ref2)) / jnp.max(jnp.abs(ref2)))
    assert out3.shape == (batch2, size)
    assert rel_err < 0.08, f"bf16 path relative error too large: {rel_err}"

    print("KERNEL_OK")
</pallas_src>

<mosaic_0001>
module attributes {stable_mosaic.version = 11 : i64} {
  func.func @kernel(%arg0: i32, %arg1: memref<8x128xf32, #tpu.memory_space<vmem>>, %arg2: memref<128x128xf32, #tpu.memory_space<vmem>>, %arg3: memref<128x128xf32, #tpu.memory_space<vmem>>, %arg4: memref<128x128xf32, #tpu.memory_space<vmem>>, %arg5: memref<3x128xf32, #tpu.memory_space<vmem>>, %arg6: memref<8x128xf32, #tpu.memory_space<vmem>>) attributes {dimension_semantics = [#tpu.dimension_semantics<parallel>], iteration_bounds = array<i64: 1>, scalar_prefetch = 0 : i64, scratch_operands = 0 : i64, tpu.core_type = #tpu.core_type<tc>, window_params = [{transform_indices = @transform_0, window_bounds = array<i64: 8, 128>}, {pipeline_mode = #tpu.pipeline_mode<synchronous>, transform_indices = @transform_1, window_bounds = array<i64: 128, 128>}, {pipeline_mode = #tpu.pipeline_mode<synchronous>, transform_indices = @transform_2, window_bounds = array<i64: 128, 128>}, {pipeline_mode = #tpu.pipeline_mode<synchronous>, transform_indices = @transform_3, window_bounds = array<i64: 128, 128>}, {pipeline_mode = #tpu.pipeline_mode<synchronous>, transform_indices = @transform_4, window_bounds = array<i64: 3, 128>}, {transform_indices = @transform_5, window_bounds = array<i64: 8, 128>}]} {
    %c0 = arith.constant 0 : index
    %c0_0 = arith.constant 0 : index
    %0 = vector.load %arg1[%c0, %c0_0] : memref<8x128xf32, #tpu.memory_space<vmem>>, vector<8x128xf32>
    %c0_1 = arith.constant 0 : index
    %c0_2 = arith.constant 0 : index
    %1 = vector.load %arg2[%c0_1, %c0_2] : memref<128x128xf32, #tpu.memory_space<vmem>>, vector<128x128xf32>
    %cst = arith.constant dense<0.000000e+00> : vector<8x128xf32>
    %2 = tpu.matmul %0, %1, %cst {dimension_numbers = #tpu.dot_dimension_numbers<[1], [1], [0], [0], [0, 0, 1, 0], [], []>} : vector<8x128xf32>, vector<128x128xf32>, vector<8x128xf32> -> vector<8x128xf32>
    %c0_3 = arith.constant 0 : index
    %c0_4 = arith.constant 0 : index
    %3 = vector.load %arg5[%c0_3, %c0_4] : memref<3x128xf32, #tpu.memory_space<vmem>>, vector<1x128xf32>
    %4 = vector.broadcast %3 : vector<1x128xf32> to vector<8x128xf32>
    %5 = arith.addf %2, %4 : vector<8x128xf32>
    %c0_5 = arith.constant 0 : index
    %c0_6 = arith.constant 0 : index
    %6 = vector.load %arg3[%c0_5, %c0_6] : memref<128x128xf32, #tpu.memory_space<vmem>>, vector<128x128xf32>
    %cst_7 = arith.constant dense<0.000000e+00> : vector<8x128xf32>
    %7 = tpu.matmul %5, %6, %cst_7 {dimension_numbers = #tpu.dot_dimension_numbers<[1], [1], [0], [0], [0, 0, 1, 0], [], []>} : vector<8x128xf32>, vector<128x128xf32>, vector<8x128xf32> -> vector<8x128xf32>
    %c1 = arith.constant 1 : index
    %c0_8 = arith.constant 0 : index
    %8 = vector.load %arg5[%c1, %c0_8] : memref<3x128xf32, #tpu.memory_space<vmem>>, vector<1x128xf32>
    %9 = vector.broadcast %8 : vector<1x128xf32> to vector<8x128xf32>
    %10 = arith.addf %7, %9 : vector<8x128xf32>
    %c0_9 = arith.constant 0 : index
    %c0_10 = arith.constant 0 : index
    %11 = vector.load %arg4[%c0_9, %c0_10] : memref<128x128xf32, #tpu.memory_space<vmem>>, vector<128x128xf32>
    %cst_11 = arith.constant dense<0.000000e+00> : vector<8x128xf32>
    %12 = tpu.matmul %10, %11, %cst_11 {dimension_numbers = #tpu.dot_dimension_numbers<[1], [1], [0], [0], [0, 0, 1, 0], [], []>} : vector<8x128xf32>, vector<128x128xf32>, vector<8x128xf32> -> vector<8x128xf32>
    %c2 = arith.constant 2 : index
    %c0_12 = arith.constant 0 : index
    %13 = vector.load %arg5[%c2, %c0_12] : memref<3x128xf32, #tpu.memory_space<vmem>>, vector<1x128xf32>
    %14 = vector.broadcast %13 : vector<1x128xf32> to vector<8x128xf32>
    %15 = arith.addf %12, %14 : vector<8x128xf32>
    %c0_13 = arith.constant 0 : index
    %c0_14 = arith.constant 0 : index
    %16 = vector.load %arg6[%c0_13, %c0_14] : memref<8x128xf32, #tpu.memory_space<vmem>>, vector<8x128xf32>
    tpu.vector_store %arg6[%c0_13, %c0_14], %15 {strides = array<i32>} : memref<8x128xf32, #tpu.memory_space<vmem>>, vector<8x128xf32>,
    return
  }
  func.func @transform_0(%arg0: i32) -> (i32, i32) {
    %c0_i32 = arith.constant 0 : i32
    %c0_i32_0 = arith.constant 0 : i32
    return %arg0, %c0_i32 : i32, i32
  }
  func.func @transform_1(%arg0: i32) -> (i32, i32) {
    %c0_i32 = arith.constant 0 : i32
    %c0_i32_0 = arith.constant 0 : i32
    %c0_i32_1 = arith.constant 0 : i32
    return %c0_i32, %c0_i32_0 : i32, i32
  }
  func.func @transform_2(%arg0: i32) -> (i32, i32) {
    %c0_i32 = arith.constant 0 : i32
    %c0_i32_0 = arith.constant 0 : i32
    %c0_i32_1 = arith.constant 0 : i32
    return %c0_i32, %c0_i32_0 : i32, i32
  }
  func.func @transform_3(%arg0: i32) -> (i32, i32) {
    %c0_i32 = arith.constant 0 : i32
    %c0_i32_0 = arith.constant 0 : i32
    %c0_i32_1 = arith.constant 0 : i32
    return %c0_i32, %c0_i32_0 : i32, i32
  }
  func.func @transform_4(%arg0: i32) -> (i32, i32) {
    %c0_i32 = arith.constant 0 : i32
    %c0_i32_0 = arith.constant 0 : i32
    %c0_i32_1 = arith.constant 0 : i32
    return %c0_i32, %c0_i32_0 : i32, i32
  }
  func.func @transform_5(%arg0: i32) -> (i32, i32) {
    %c0_i32 = arith.constant 0 : i32
    %c0_i32_0 = arith.constant 0 : i32
    return %arg0, %c0_i32 : i32, i32
  }
}

</mosaic_0001>

<bundles_post_ra>
// kernel: tpu_custom_call.1
= control target key start
LH: loop header
LB: loop body
LE: loop exit
PB: predicated region body
PF: predicated region fallthrough
CT: control target
= control target key end

     0   :  { %10 = vsyncpa [#allocation3], 0  ;;  %s873_s0 = inlined_call_operand.hbm [shape: f32[8,128], index: 0, kind: input, shape index: {}]   ;;  %s874_s1 = inlined_call_operand.hbm [shape: f32[128,128], index: 1, kind: input, shape index: {}]   ;;  %s875_s2 = inlined_call_operand.hbm [shape: f32[128,128], index: 2, kind: input, shape index: {}]   ;;  %s876_s3 = inlined_call_operand.hbm [shape: f32[128,128], index: 3, kind: input, shape index: {}]   ;;  %s877_s4 = inlined_call_operand.vmem [shape: f32[3,128], index: 4, kind: input, shape index: {}]   ;;  %s878_s5 = inlined_call_operand.hbm [shape: f32[8,128], index: 5, kind: output, shape index: {}]  }
   0x1   :  { %11 = vsyncpa [#allocation6], 0 }
   0x2   :  { %12 = vsyncpa [#allocation9], 0 }
   0x3   :  { %13 = vsyncpa [#allocation4], 0  ;;  %s725_s18 = smov [#allocation5]   ;;  %s607_s22 = scalar_lea.hbm %s874_s1, 2048 }
   0x4   :  { %s29_s19 = sshll.u32 %s725_s18, 4  ;;  %p608_p0 = scmp.ne.s32.totalorder %s874_s1, %s607_s22  ;;  %s30_s19 = int_to_ptr.vmem [resolvable:$true] %s29_s19 }
   0x5   :  { %p611_p1 = scmp.lt.u32.totalorder %s607_s22, %s874_s1 }
   0x7   :  { %p613_p2 = pnand %p611_p1, %p608_p0 }
   0x9   :  { %616 = shalt.err (!%p613_p2)
}
   0xa   :  { %s617_s27 = scalar_lea.vmem %s30_s19, 2048  ;;  %p622_p4 = scmp.lt.s32.totalorder %s30_s19, %s30_s19 }
   0xb   :  { %p618_p3 = scmp.ne.s32.totalorder %s30_s19, %s617_s27  ;;  %p623_p5 = scmp.lt.s32.totalorder %s617_s27, %s617_s27 }
   0xd   :  { %p624_p6 = por %p623_p5, %p622_p4 }
   0xf   :  { %p625_p7 = pnand %p624_p6, %p618_p3 }
  0x11   :  { %628 = shalt.err (!%p625_p7)
}
  0x12   :  { %s726_s28 = smov 128   ;;  %s727_s29 = smov 8  }
  0x13   :  { %35 = dma.hbm_to_vmem [thread:$0]  %s874_s1, 2048, %s30_s19, [#allocation6], %s726_s28, %s726_s28, %s727_s29  }
  0x14   :  { %s728_s7 = smov [#allocation2]   ;;  %s729_s9 = smov [#allocation7]  }
  0x15   :  { %s20_s8 = sshll.u32 %s728_s7, 4  ;;  %s41_s10 = sshll.u32 %s729_s9, 4  ;;  %s21_s8 = int_to_ptr.vmem [resolvable:$true] %s20_s8  ;;  %s42_s10 = int_to_ptr.vmem [resolvable:$true] %s41_s10 }
  0x16   :  { %s629_s13 = scalar_lea.hbm %s873_s0, 128 }
  0x17   :  { %p630_p8 = scmp.ne.s32.totalorder %s873_s0, %s629_s13  ;;  %p633_p9 = scmp.lt.u32.totalorder %s629_s13, %s873_s0 }
  0x19   :  { %p635_p10 = pnand %p633_p9, %p630_p8 }
  0x1b   :  { %638 = shalt.err (!%p635_p10)
}
  0x1c   :  { %s639_s1 = scalar_lea.vmem %s21_s8, 128  ;;  %p644_p12 = scmp.lt.s32.totalorder %s21_s8, %s21_s8 }
  0x1d   :  { %p640_p11 = scmp.ne.s32.totalorder %s21_s8, %s639_s1  ;;  %p645_p13 = scmp.lt.s32.totalorder %s639_s1, %s639_s1 }
  0x1f   :  { %p646_p0 = por %p645_p13, %p644_p12 }
  0x21   :  { %p647_p1 = pnand %p646_p0, %p640_p11 }
  0x23   :  { %650 = shalt.err (!%p647_p1)
}
  0x24   :  { %23 = dma.hbm_to_vmem [thread:$0]  %s873_s0, 128, %s21_s8, [#allocation3]  }
  0x25   :  { %s651_s22 = scalar_lea.hbm %s875_s2, 2048 }
  0x26   :  { %p652_p2 = scmp.ne.s32.totalorder %s875_s2, %s651_s22  ;;  %p655_p3 = scmp.lt.u32.totalorder %s651_s22, %s875_s2 }
  0x28   :  { %p657_p4 = pnand %p655_p3, %p652_p2 }
  0x2a   :  { %660 = shalt.err (!%p657_p4)
}
  0x2b   :  { %s661_s27 = scalar_lea.vmem %s42_s10, 2048  ;;  %p666_p6 = scmp.lt.s32.totalorder %s42_s10, %s42_s10 }
  0x2c   :  { %p662_p5 = scmp.ne.s32.totalorder %s42_s10, %s661_s27  ;;  %p667_p7 = scmp.lt.s32.totalorder %s661_s27, %s661_s27 }
  0x2e   :  { %p668_p8 = por %p667_p7, %p666_p6 }
  0x30   :  { %p669_p9 = pnand %p668_p8, %p662_p5 }
  0x32   :  { %672 = shalt.err (!%p669_p9)
}
  0x33   :  { %47 = dma.hbm_to_vmem [thread:$0]  %s875_s2, 2048, %s42_s10, [#allocation6], %s726_s28, %s726_s28, %s727_s29  }
  0x34   :  { %s730_s6 = smov [#allocation8]   ;;  %s673_s11 = scalar_lea.hbm %s876_s3, 2048 }
  0x35   :  { %s53_s7 = sshll.u32 %s730_s6, 4  ;;  %p674_p10 = scmp.ne.s32.totalorder %s876_s3, %s673_s11  ;;  %s54_s7 = int_to_ptr.vmem [resolvable:$true] %s53_s7 }
  0x36   :  { %p677_p11 = scmp.lt.u32.totalorder %s673_s11, %s876_s3 }
  0x38   :  { %p679_p12 = pnand %p677_p11, %p674_p10 }
  0x3a   :  { %682 = shalt.err (!%p679_p12)
}
  0x3b   :  { %s683_s16 = scalar_lea.vmem %s54_s7, 2048  ;;  %p688_p0 = scmp.lt.s32.totalorder %s54_s7, %s54_s7 }
  0x3c   :  { %p684_p13 = scmp.ne.s32.totalorder %s54_s7, %s683_s16  ;;  %p689_p1 = scmp.lt.s32.totalorder %s683_s16, %s683_s16 }
  0x3e   :  { %p690_p2 = por %p689_p1, %p688_p0 }
  0x40   :  { %p691_p3 = pnand %p690_p2, %p684_p13 }
  0x42   :  { %694 = shalt.err (!%p691_p3)
}
  0x43   :  { %59 = dma.hbm_to_vmem [thread:$0]  %s876_s3, 2048, %s54_s7, [#allocation9], %s726_s28, %s726_s28, %s727_s29  }
  0x44   :  { %717 = dma.done.wait [#allocation3], 128  }
  0x45   :  { %718 = vsyncadd [#allocation3], 4294967168 }
  0x46   :  { %719 = dma.done.wait [#allocation6], 4096  }
  0x47   :  { %720 = vsyncadd [#allocation6], 4294963200 }
  0x48   :  { %721 = dma.done.wait [#allocation9], 2048  }
  0x49   :  { %722 = vsyncadd [#allocation9], 4294965248  ;;  %v731_v0 = vmov 0.0|0.0   ;;  %vm732_vm0 = vmmov 0   ;;  %v733_v1 = vmov 0.0   ;;  %v75_v2 = vld [vmem:[#allocation5] sm:$0xff] }
  0x4a   :  { %525 = vmatprep.subr.bf16.mxu0 %v731_v0  ;;  %452 = vmatprep.mubr.msk.f32.mxu0 %vm732_vm0, %v733_v1  ;;  %v76_v3 = vld [vmem:[#allocation5 + $0x8] sm:$0xff]  ;;  %v77_v5 = vld [vmem:[#allocation5 + $0x10] sm:$0xff]  ;;  %v78_v6 = vld [vmem:[#allocation5 + $0x18] sm:$0xff]  ;;  %s734_s19 = smov [#allocation10]  }
  0x4b   :  { %549 = vmatprep.subr.bf16.mxu1 %v731_v0  ;;  %487 = vmatprep.mubr.msk.f32.mxu1 %vm732_vm0, %v733_v1  ;;  %v526_v4 = vpack.c.bf16 %v76_v3, %v75_v2  ;;  %v166_v7 = vld [vmem:[#allocation7] sm:$0xff]  ;;  %v167_v8 = vld [vmem:[#allocation7 + $0x8] sm:$0xff]  ;;  %v529_v9 = vpack.c.bf16 %v78_v6, %v77_v5  ;;  %v168_v11 = vld [vmem:[#allocation7 + $0x10] sm:$0xff]  ;;  %s355_s20 = sshll.u32 %s734_s19, 4  ;;  %s356_s20 = int_to_ptr.vmem [resolvable:$true] %s355_s20 }
  0x4c   :  { %v550_v10 = vpack.c.bf16 %v167_v8, %v166_v7  ;;  %v169_v12 = vld [vmem:[#allocation7 + $0x18] sm:$0xff]  ;;  %v79_v13 = vld [vmem:[#allocation5 + $0x20] sm:$0xff]  ;;  %v80_v14 = vld [vmem:[#allocation5 + $0x28] sm:$0xff]  ;;  %s695_s21 = scalar_lea.vmem %s356_s20, 128  ;;  %p700_p5 = scmp.lt.s32.totalorder %s356_s20, %s356_s20 }
  0x4d   :  { %527 = vmatpush3.bf16.xpose.msra.mxu0 %v526_v4  ;;  %v553_v15 = vpack.c.bf16 %v169_v12, %v168_v11  ;;  %v532_v16 = vpack.c.bf16 %v80_v14, %v79_v13  ;;  %v170_v17 = vld [vmem:[#allocation7 + $0x20] sm:$0xff]  ;;  %v171_v18 = vld [vmem:[#allocation7 + $0x28] sm:$0xff]  ;;  %v81_v19 = vld [vmem:[#allocation5 + $0x30] sm:$0xff]  ;;  %p696_p4 = scmp.ne.s32.totalorder %s356_s20, %s695_s21  ;;  %p701_p6 = scmp.lt.s32.totalorder %s695_s21, %s695_s21 }
  0x4e   :  { %528 = vmatprep.subr.bf16.mxu0 %v731_v0  ;;  %551 = vmatpush3.bf16.xpose.msra.mxu1 %v550_v10  ;;  %v82_v20 = vld [vmem:[#allocation5 + $0x38] sm:$0xff]  ;;  %v556_v21 = vpack.c.bf16 %v171_v18, %v170_v17  ;;  %v172_v23 = vld [vmem:[#allocation7 + $0x30] sm:$0xff]  ;;  %v83_v25 = vld [vmem:[#allocation5 + $0x40] sm:$0xff] }
  0x4f   :  { %552 = vmatprep.subr.bf16.mxu1 %v731_v0  ;;  %v535_v22 = vpack.c.bf16 %v82_v20, %v81_v19  ;;  %v173_v24 = vld [vmem:[#allocation7 + $0x38] sm:$0xff]  ;;  %v84_v26 = vld [vmem:[#allocation5 + $0x48] sm:$0xff]  ;;  %v174_v29 = vld [vmem:[#allocation7 + $0x40] sm:$0xff]  ;;  %p702_p7 = por %p701_p6, %p700_p5 }
  0x50   :  { %v559_v27 = vpack.c.bf16 %v173_v24, %v172_v23  ;;  %v538_v28 = vpack.c.bf16 %v84_v26, %v83_v25  ;;  %v175_v30 = vld [vmem:[#allocation7 + $0x48] sm:$0xff]  ;;  %v85_v31 = vld [vmem:[#allocation5 + $0x50] sm:$0xff]  ;;  %v86_v32 = vld [vmem:[#allocation5 + $0x58] sm:$0xff] }
  0x51   :  { %v562_v33 = vpack.c.bf16 %v175_v30, %v174_v29  ;;  %v541_v34 = vpack.c.bf16 %v86_v32, %v85_v31  ;;  %v176_v35 = vld [vmem:[#allocation7 + $0x50] sm:$0xff]  ;;  %v177_v36 = vld [vmem:[#allocation7 + $0x58] sm:$0xff]  ;;  %v87_v37 = vld [vmem:[#allocation5 + $0x60] sm:$0xff]  ;;  %p703_p8 = pnand %p702_p7, %p696_p4 }
  0x52   :  { %v88_v38 = vld [vmem:[#allocation5 + $0x68] sm:$0xff]  ;;  %v565_v39 = vpack.c.bf16 %v177_v36, %v176_v35  ;;  %v178_v41 = vld [vmem:[#allocation7 + $0x60] sm:$0xff]  ;;  %v89_v43 = vld [vmem:[#allocation5 + $0x70] sm:$0xff] }
  0x53   :  { %v544_v40 = vpack.c.bf16 %v88_v38, %v87_v37  ;;  %v179_v42 = vld [vmem:[#allocation7 + $0x68] sm:$0xff]  ;;  %v90_v44 = vld [vmem:[#allocation5 + $0x78] sm:$0xff]  ;;  %v180_v47 = vld [vmem:[#allocation7 + $0x70] sm:$0xff] }
  0x54   :  { %v568_v45 = vpack.c.bf16 %v179_v42, %v178_v41  ;;  %v547_v46 = vpack.c.bf16 %v90_v44, %v89_v43  ;;  %v181_v48 = vld [vmem:[#allocation7 + $0x78] sm:$0xff]  ;;  %v257_v51 = vld [vmem:[#allocation8] sm:$0xff]  ;;  %v258_v52 = vld [vmem:[#allocation8 + $0x8] sm:$0xff] }
  0x55   :  { %530 = vmatpush3.bf16.xpose.msra.mxu0 %v529_v9  ;;  %v571_v49 = vpack.c.bf16 %v181_v48, %v180_v47  ;;  %v74_v50 = vld [vmem:[#allocation2] sm:$0xff]  ;;  %v574_v53 = vpack.c.bf16 %v258_v52, %v257_v51  ;;  %v259_v54 = vld [vmem:[#allocation8 + $0x10] sm:$0xff]  ;;  %v261_v57 = vld [vmem:[#allocation8 + $0x20] sm:$0xff] }
  0x56   :  { %531 = vmatprep.subr.bf16.mxu0 %v731_v0  ;;  %554 = vmatpush3.bf16.xpose.msra.mxu1 %v553_v15  ;;  %v260_v55 = vld [vmem:[#allocation8 + $0x18] sm:$0xff]  ;;  %v262_v58 = vld [vmem:[#allocation8 + $0x28] sm:$0xff]  ;;  %v263_v60 = vld [vmem:[#allocation8 + $0x30] sm:$0xff] }
  0x57   :  { %555 = vmatprep.subr.bf16.mxu1 %v731_v0  ;;  %v577_v56 = vpack.c.bf16 %v260_v55, %v259_v54  ;;  %v580_v59 = vpack.c.bf16 %v262_v58, %v261_v57  ;;  %v264_v61 = vld [vmem:[#allocation8 + $0x38] sm:$0xff]  ;;  %v265_v63 = vld [vmem:[#allocation8 + $0x40] sm:$0xff]  ;;  %v267_v3 = vld [vmem:[#allocation8 + $0x50] sm:$0xff] }
  0x58   :  { %v583_v62 = vpack.c.bf16 %v264_v61, %v263_v60  ;;  %v268_v4 = vld [vmem:[#allocation8 + $0x58] sm:$0xff]  ;;  %v269_v6 = vld [vmem:[#allocation8 + $0x60] sm:$0xff]  ;;  %v270_v7 = vld [vmem:[#allocation8 + $0x68] sm:$0xff] }
  0x59   :  { %v589_v5 = vpack.c.bf16 %v268_v4, %v267_v3  ;;  %v592_v8 = vpack.c.bf16 %v270_v7, %v269_v6  ;;  %v271_v9 = vld [vmem:[#allocation8 + $0x70] sm:$0xff]  ;;  %v272_v10 = vld [vmem:[#allocation8 + $0x78] sm:$0xff] }
  0x5a   :  { %v595_v11 = vpack.c.bf16 %v272_v10, %v271_v9  ;;  %v366_v12 = vld [vmem:[%s877_s4] ss:$0 sm:$0xff] }
  0x5d   :  { %533 = vmatpush3.bf16.xpose.msra.mxu0 %v532_v16  ;;  %v367_v16 = vld [vmem:[%s877_s4 + $0x1] ss:$0 sm:$0xff] }
  0x5e   :  { %534 = vmatprep.subr.bf16.mxu0 %v731_v0  ;;  %557 = vmatpush3.bf16.xpose.msra.mxu1 %v556_v21 }
  0x5f   :  { %558 = vmatprep.subr.bf16.mxu1 %v731_v0 }
  0x65   :  { %536 = vmatpush3.bf16.xpose.msra.mxu0 %v535_v22 }
  0x66   :  { %537 = vmatprep.subr.bf16.mxu0 %v731_v0  ;;  %560 = vmatpush3.bf16.xpose.msra.mxu1 %v559_v27 }
  0x67   :  { %561 = vmatprep.subr.bf16.mxu1 %v731_v0 }
  0x6d   :  { %539 = vmatpush3.bf16.xpose.msra.mxu0 %v538_v28 }
  0x6e   :  { %540 = vmatprep.subr.bf16.mxu0 %v731_v0  ;;  %563 = vmatpush3.bf16.xpose.msra.mxu1 %v562_v33 }
  0x6f   :  { %564 = vmatprep.subr.bf16.mxu1 %v731_v0 }
  0x75   :  { %542 = vmatpush3.bf16.xpose.msra.mxu0 %v541_v34 }
  0x76   :  { %543 = vmatprep.subr.bf16.mxu0 %v731_v0  ;;  %566 = vmatpush3.bf16.xpose.msra.mxu1 %v565_v39 }
  0x77   :  { %567 = vmatprep.subr.bf16.mxu1 %v731_v0 }
  0x7d   :  { %545 = vmatpush3.bf16.xpose.msra.mxu0 %v544_v40 }
  0x7e   :  { %546 = vmatprep.subr.bf16.mxu0 %v731_v0  ;;  %569 = vmatpush3.bf16.xpose.msra.mxu1 %v568_v45 }
  0x7f   :  { %570 = vmatprep.subr.bf16.mxu1 %v731_v0 }
  0x85   :  { %548 = vmatpush3.bf16.xpose.msra.mxu0 %v547_v46 }
  0x86   :  { %573 = vmatprep.subr.bf16.mxu0 %v731_v0  ;;  %572 = vmatpush3.bf16.xpose.msra.mxu1 %v571_v49 }
  0x8c   :  { %453 = vmatmul.mubr.f32.vlgmr.msra.gmra.mrb[0].mxu0 %v74_v50 }
  0x8d   :  { %522 = vmatprep.mubr.msk.f32.mxu0 %vm732_vm0, %v733_v1  ;;  %575 = vmatpush3.bf16.xpose.msra.mxu0 %v574_v53  ;;  %v266_v1 = vld [vmem:[#allocation8 + $0x48] sm:$0xff] }
  0x8e   :  { %576 = vmatprep.subr.bf16.mxu0 %v731_v0  ;;  %v586_v2 = vpack.c.bf16 %v266_v1, %v265_v63 }
  0x95   :  { %578 = vmatpush3.bf16.xpose.msra.mxu0 %v577_v56 }
  0x96   :  { %579 = vmatprep.subr.bf16.mxu0 %v731_v0 }
  0x9d   :  { %581 = vmatpush3.bf16.xpose.msra.mxu0 %v580_v59 }
  0x9e   :  { %582 = vmatprep.subr.bf16.mxu0 %v731_v0 }
  0xa5   :  { %584 = vmatpush3.bf16.xpose.msra.mxu0 %v583_v62 }
  0xa6   :  { %585 = vmatprep.subr.bf16.mxu0 %v731_v0 }
  0xad   :  { %587 = vmatpush3.bf16.xpose.msra.mxu0 %v586_v2 }
  0xae   :  { %588 = vmatprep.subr.bf16.mxu0 %v731_v0 }
  0xb5   :  { %590 = vmatpush3.bf16.xpose.msra.mxu0 %v589_v5 }
  0xb6   :  { %591 = vmatprep.subr.bf16.mxu0 %v731_v0 }
  0xbd   :  { %593 = vmatpush3.bf16.xpose.msra.mxu0 %v592_v8 }
  0xbe   :  { %594 = vmatprep.subr.bf16.mxu0 %v731_v0  ;;  %v368_v0 = vld [vmem:[%s877_s4 + $0x2] ss:$0 sm:$0xff] }
  0xc5   :  { %596 = vmatpush3.bf16.xpose.msra.mxu0 %v595_v11 }
 0x15f   :  { %v162_v13 = vpop.f32.mrb[0].mxu0 }
 0x160   :  { %v163_v14 = vadd.f32 %v366_v12, %v162_v13  ;;  %v454_v15 = vpop.f32.mrb[1].mxu0 }
 0x162   :  { %488 = vmatmul.mubr.f32.vlgmr.msra.gmra.mrb[0].mxu1 %v163_v14 }
 0x235   :  { %v253_v17 = vpop.f32.mrb[0].mxu1 }
 0x236   :  { %v254_v18 = vadd.f32 %v367_v16, %v253_v17  ;;  %v489_v19 = vpop.f32.mrb[1].mxu1 }
 0x238   :  { %523 = vmatmul.mubr.f32.vlgmr.msra.gmra.mrb[2].mxu0 %v254_v18 }
 0x30b   :  { %v344_v20 = vpop.f32.mrb[2].mxu0 }
 0x30c   :  { %v345_v21 = vadd.f32 %v368_v0, %v344_v20  ;;  %v524_v22 = vpop.f32.mrb[3].mxu0 }
 0x30e   :  { %348 = vst [vmem:[#allocation10] sm:$0xff] %v345_v21 }
 0x30f   :  { %706 = shalt.err (!%p703_p8)
}
 0x310   :  { %s707_s24 = scalar_lea.hbm %s878_s5, 128 }
 0x311   :  { %p708_p9 = scmp.ne.s32.totalorder %s878_s5, %s707_s24  ;;  %p711_p10 = scmp.lt.u32.totalorder %s707_s24, %s878_s5 }
 0x313   :  { %p713_p11 = pnand %p711_p10, %p708_p9 }
 0x315   :  { %716 = shalt.err (!%p713_p11)
}
 0x316   :  { %358 = dma.vmem_to_hbm [thread:$0]  %s356_s20, 128, %s878_s5, [#allocation4]  }
 0x317   :  { %723 = dma.done.wait [#allocation4], 128  }
 0x318   :  { %724 = vsyncadd [#allocation4], 4294967168 }
 0x319   :  { %362 = vsyncpa [#allocation3], 1 }
 0x31a   :  { %363 = vsyncpa [#allocation6], 1 }
 0x31b   :  { %364 = vsyncpa [#allocation9], 1 }
 0x31c   :  { %365 = vsyncpa [#allocation4], 1 }

</bundles_post_ra>
